<compile_context>
chip_gen: v6e
topology: v6e:2x2x1
jax: 0.10.0
libtpu: 0.0.40
codegen_flags: <defaults>
</compile_context>

<pallas_src>
import functools

import jax
import jax.numpy as jnp
from jax import lax
from jax.experimental import pallas as pl
from jax.experimental.pallas import tpu as pltpu

LANES = 128
H1 = 32          # linear1 out features
H2 = 64          # linear2 out features


def _round_up(x, m):
    return (x + m - 1) // m * m


def init_params(key, state_size):
    """PyTorch-style nn.Linear init: weight (out, in), U(-1/sqrt(in), 1/sqrt(in))."""
    def linear(k, fan_in, fan_out):
        kw, kb = jax.random.split(k)
        bound = 1.0 / (fan_in ** 0.5)
        w = jax.random.uniform(kw, (fan_out, fan_in), jnp.float32, -bound, bound)
        b = jax.random.uniform(kb, (fan_out,), jnp.float32, -bound, bound)
        return w, b

    k1, k2, k3 = jax.random.split(key, 3)
    w1, b1 = linear(k1, state_size, H1)
    w2, b2 = linear(k2, H1, H2)
    w3, b3 = linear(k3, H2, 1)
    return (w1, b1, w2, b2, w3, b3)


def pack_params(params):
    """Pack (w1,b1,w2,b2,w3,b3) into two small resident slabs.

    wb_bf16 (96, 128) bf16: rows [0,32) cols [0,S)  = W1
                            rows [32,96) cols [0,32) = W2
    vec_f32 (64, 128) f32 : col 0 = b1, col 1 = b2, col 2 = w3, [0,3] = b3
    """
    w1, b1, w2, b2, w3, b3 = params
    s = w1.shape[1]
    if s > LANES:
        raise ValueError(f"state_size={s} > {LANES} not supported by this packing")
    wb = jnp.zeros((H1 + H2, LANES), jnp.float32)
    wb = wb.at[0:H1, :s].set(w1.astype(jnp.float32))
    wb = wb.at[H1:H1 + H2, :H1].set(w2.astype(jnp.float32))
    wb = wb.astype(jnp.bfloat16)

    vec = jnp.zeros((H2, LANES), jnp.float32)
    vec = vec.at[0:H1, 0].set(b1.astype(jnp.float32))
    vec = vec.at[0:H2, 1].set(b2.astype(jnp.float32))
    vec = vec.at[0:H2, 2].set(w3[0].astype(jnp.float32))
    vec = vec.at[0, 3].set(b3[0].astype(jnp.float32))
    return wb, vec


@functools.lru_cache(maxsize=None)
def _vmem_budget():
    """(max batch-tile rows, vmem_limit_bytes) per TPU generation.

    VMEM per batch row: ~1 KiB double-buffered f32 input block (lane-padded to
    128), ~0.25 KiB bf16 cast, ~0.45 KiB for the (32|64, tile_b) intermediates
    => ~1.7-2 KiB/row.  16K rows ~ 30 MiB (fits v5e/v6e 128 MiB), 8K rows
    ~ 15 MiB (fits v7x 64 MiB physical / 32 MiB scoped).
    """
    try:
        phys = int(pltpu.get_tpu_info().vmem_capacity_bytes)
    except Exception:
        phys = 64 * 1024 * 1024
    if phys >= 100 * 1024 * 1024:           # v5e / v6e: 128 MiB per core
        return 16384, 64 * 1024 * 1024
    if phys >= 48 * 1024 * 1024:            # v7x: 64 MiB per core
        return 8192, 32 * 1024 * 1024
    return 2048, None                       # older / smaller parts: conservative


def _critic_kernel(x_ref, wb_ref, vec_ref, out_ref, *, s):
    # x_ref:   (tile_b, s)     state tile, exactly as laid out in HBM
    # wb_ref:  (96, 128) bf16  W1 / W2, resident across the whole grid
    # vec_ref: (64, 128) f32   b1 / b2 / w3 columns + b3 scalar, resident
    # out_ref: (1, tile_b)     value row, batch on the 128-lane axis (lane-dense)
    xt = x_ref[...].astype(jnp.bfloat16)          # (tile_b, s)

    w1 = wb_ref[0:H1, 0:s]                        # (32, s)  bf16
    w2 = wb_ref[H1:H1 + H2, 0:H1]                 # (64, 32) bf16
    b1 = vec_ref[0:H1, 0:1]                       # (32, 1)  f32
    b2 = vec_ref[0:H2, 1:2]                       # (64, 1)  f32
    w3 = vec_ref[0:H2, 2:3]                       # (64, 1)  f32
    b3 = vec_ref[0:1, 3:4]                        # (1, 1)   f32

    # Layer 1: contract the minor (feature) dims of W1 and the state tile on the
    # MXU (q @ k.T pattern) -> (32, tile_b).  The batch moves onto the lane axis
    # with no explicit transpose and no wrapper-side copy.
    h1 = lax.dot_general(w1, xt, (((1,), (1,)), ((), ())),
                         preferred_element_type=jnp.float32)
    h1 = jnp.maximum(h1 + b1, 0.0)                # (32, tile_b) f32

    # Layer 2: bf16 MXU, f32 accumulation.
    h2 = jnp.dot(w2, h1.astype(jnp.bfloat16),
                 preferred_element_type=jnp.float32)
    h2 = jnp.maximum(h2 + b2, 0.0)                # (64, tile_b) f32

    # Layer 3 (64 -> 1): VPU multiply + sublane (XLU) reduce, explicit scalar b3.
    out_ref[...] = jnp.sum(h2 * w3, axis=0, keepdims=True) + b3


@functools.partial(jax.jit, static_argnames=("tile_b", "n_tiles", "vmem_limit"))
def _pallas_forward(x, wb, vec, *, tile_b, n_tiles, vmem_limit):
    b, s = x.shape
    b_total = n_tiles * tile_b
    if b_total != b:
        # Only ragged batches get padded (< n_tiles*128 rows); tile-aligned large
        # batches pass straight through with zero wrapper traffic.
        x = jnp.pad(x, ((0, b_total - b), (0, 0)))

    out = pl.pallas_call(
        functools.partial(_critic_kernel, s=s),
        out_shape=jax.ShapeDtypeStruct((1, b_total), jnp.float32),
        grid_spec=pltpu.PrefetchScalarGridSpec(
            num_scalar_prefetch=0,
            grid=(n_tiles,),
            in_specs=[
                pl.BlockSpec((tile_b, s), lambda i: (i, 0)),        # state tiles
                pl.BlockSpec((H1 + H2, LANES), lambda i: (0, 0)),   # bf16 weights, resident
                pl.BlockSpec((H2, LANES), lambda i: (0, 0)),        # f32 biases/w3, resident
            ],
            out_specs=pl.BlockSpec((1, tile_b), lambda i: (0, i)),
        ),
        compiler_params=pltpu.CompilerParams(
            dimension_semantics=("parallel",),
            vmem_limit_bytes=vmem_limit,
        ),
    )(x, wb, vec)
    return out[0, :b].reshape(b, 1)


@jax.jit
def _critic_xla(x, wb, vec):
    """Plain-XLA fallback numerically mirroring the kernel (bf16 matmuls, f32 acc)."""
    s = x.shape[1]
    w1 = wb[0:H1, 0:s]
    w2 = wb[H1:H1 + H2, 0:H1]
    b1 = vec[0:H1, 0]
    b2 = vec[0:H2, 1]
    w3 = vec[0:H2, 2]
    b3 = vec[0, 3]
    h1 = jnp.maximum(jnp.dot(x.astype(jnp.bfloat16), w1.T,
                             preferred_element_type=jnp.float32) + b1, 0.0)
    h2 = jnp.maximum(jnp.dot(h1.astype(jnp.bfloat16), w2.T,
                             preferred_element_type=jnp.float32) + b2, 0.0)
    return jnp.dot(h2, w3[:, None]) + b3


def critic_forward(x, packed_params, *, min_pallas_batch=0):
    """Critic.forward: x (B, state_size) -> value (B, 1)."""
    wb, vec = packed_params
    b, s = x.shape
    if s > LANES:
        raise ValueError(f"state_size={s} > {LANES} not supported by this packing")
    if b < min_pallas_batch:
        # TODO(synk): for tiny per-step batches, fuse the whole actor-critic step
        # into one pallas_call; below ~1K rows the launch overhead dominates, so
        # fall back to fused XLA instead of dispatching the kernel.
        return _critic_xla(x, wb, vec)

    tile_b_max, vmem_limit = _vmem_budget()
    b_ceil = _round_up(max(b, 1), LANES)
    n_tiles = pl.cdiv(b_ceil, tile_b_max)
    if b_ceil >= 2 * LANES:
        n_tiles = max(n_tiles, 2)        # keep both v7x TensorCores busy
    if n_tiles > 1 and n_tiles % 2:
        n_tiles += 1                     # even split across the 2 TCs
    tile_b = _round_up(pl.cdiv(b, n_tiles), LANES)
    return _pallas_forward(x, wb, vec, tile_b=tile_b, n_tiles=n_tiles,
                           vmem_limit=vmem_limit)


if __name__ == "__main__":
    key = jax.random.PRNGKey(0)
    k_params, k_s1, k_s2 = jax.random.split(key, 3)

    # action_size is accepted by Critic.__init__ but unused in forward.
    batch, state_size, action_size = 2, 8, 2
    params = init_params(k_params, state_size)
    packed = pack_params(params)
    w1, b1, w2, b2, w3, b3 = params

    def reference_f32(x):  # exact PyTorch semantics: y = x @ W.T + b
        h1 = jnp.maximum(x @ w1.T + b1, 0.0)
        h2 = jnp.maximum(h1 @ w2.T + b2, 0.0)
        return h2 @ w3.T + b3

    # Small batch (the module's nominal use) through the Pallas kernel.
    state = jax.random.normal(k_s1, (batch, state_size), jnp.float32)
    value = critic_forward(state, packed)
    jax.block_until_ready(value)
    assert value.shape == (batch, 1), f"bad shape {value.shape}"
    assert jnp.allclose(value, _critic_xla(state, *packed), atol=1e-3, rtol=1e-3)
    assert jnp.allclose(value, reference_f32(state), atol=1e-1, rtol=1e-2)

    # Ragged multi-tile batch: exercises padding + the >=2-step "parallel" grid.
    state_big = jax.random.normal(k_s2, (1000, state_size), jnp.float32)
    value_big = critic_forward(state_big, packed)
    jax.block_until_ready(value_big)
    assert value_big.shape == (1000, 1), f"bad shape {value_big.shape}"
    assert jnp.allclose(value_big, _critic_xla(state_big, *packed), atol=1e-3, rtol=1e-3)
    assert jnp.allclose(value_big, reference_f32(state_big), atol=1e-1, rtol=1e-2)

    print("KERNEL_OK")
</pallas_src>

<mosaic_0001>
module attributes {stable_mosaic.version = 11 : i64} {
  func.func @_critic_kernel(%arg0: i32, %arg1: memref<128x8xf32, #tpu.memory_space<vmem>>, %arg2: memref<96x128xbf16, #tpu.memory_space<vmem>>, %arg3: memref<64x128xf32, #tpu.memory_space<vmem>>, %arg4: memref<1x128xf32, #tpu.memory_space<vmem>>) attributes {dimension_semantics = [#tpu.dimension_semantics<parallel>], iteration_bounds = array<i64: 1>, scalar_prefetch = 0 : i64, scratch_operands = 0 : i64, tpu.core_type = #tpu.core_type<tc>, window_params = [{transform_indices = @transform_0, window_bounds = array<i64: 128, 8>}, {pipeline_mode = #tpu.pipeline_mode<synchronous>, transform_indices = @transform_1, window_bounds = array<i64: 96, 128>}, {pipeline_mode = #tpu.pipeline_mode<synchronous>, transform_indices = @transform_2, window_bounds = array<i64: 64, 128>}, {transform_indices = @transform_3, window_bounds = array<i64: 1, 128>}]} {
    %c0 = arith.constant 0 : index
    %c0_0 = arith.constant 0 : index
    %0 = vector.load %arg1[%c0, %c0_0] : memref<128x8xf32, #tpu.memory_space<vmem>>, vector<128x8xf32>
    %1 = arith.truncf %0 : vector<128x8xf32> to vector<128x8xbf16>
    %c0_1 = arith.constant 0 : index
    %c0_2 = arith.constant 0 : index
    %2 = vector.load %arg2[%c0_1, %c0_2] : memref<96x128xbf16, #tpu.memory_space<vmem>>, vector<32x8xbf16>
    %c32 = arith.constant 32 : index
    %c0_3 = arith.constant 0 : index
    %3 = vector.load %arg2[%c32, %c0_3] : memref<96x128xbf16, #tpu.memory_space<vmem>>, vector<64x32xbf16>
    %c0_4 = arith.constant 0 : index
    %c0_5 = arith.constant 0 : index
    %4 = vector.load %arg3[%c0_4, %c0_5] : memref<64x128xf32, #tpu.memory_space<vmem>>, vector<32x1xf32>
    %c0_6 = arith.constant 0 : index
    %c1 = arith.constant 1 : index
    %5 = vector.load %arg3[%c0_6, %c1] : memref<64x128xf32, #tpu.memory_space<vmem>>, vector<64x1xf32>
    %c0_7 = arith.constant 0 : index
    %c2 = arith.constant 2 : index
    %6 = vector.load %arg3[%c0_7, %c2] : memref<64x128xf32, #tpu.memory_space<vmem>>, vector<64x1xf32>
    %c0_8 = arith.constant 0 : index
    %c3 = arith.constant 3 : index
    %7 = vector.load %arg3[%c0_8, %c3] : memref<64x128xf32, #tpu.memory_space<vmem>>, vector<1x1xf32>
    %cst = arith.constant dense<0.000000e+00> : vector<32x128xf32>
    %8 = tpu.matmul %2, %1, %cst {dimension_numbers = #tpu.dot_dimension_numbers<[1], [1], [0], [0], [0, 0, 1, 0], [], []>} : vector<32x8xbf16>, vector<128x8xbf16>, vector<32x128xf32> -> vector<32x128xf32>
    %9 = vector.broadcast %4 : vector<32x1xf32> to vector<32x128xf32>
    %10 = arith.addf %8, %9 : vector<32x128xf32>
    %cst_9 = arith.constant 0.000000e+00 : f32
    %11 = vector.broadcast %cst_9 : f32 to vector<32x128xf32>
    %12 = arith.maximumf %10, %11 : vector<32x128xf32>
    %13 = arith.truncf %12 : vector<32x128xf32> to vector<32x128xbf16>
    %cst_10 = arith.constant dense<0.000000e+00> : vector<64x128xf32>
    %14 = tpu.matmul %3, %13, %cst_10 {dimension_numbers = #tpu.dot_dimension_numbers<[1], [0], [0], [1], [0, 0, 1, 1], [], []>} : vector<64x32xbf16>, vector<32x128xbf16>, vector<64x128xf32> -> vector<64x128xf32>
    %15 = vector.broadcast %5 : vector<64x1xf32> to vector<64x128xf32>
    %16 = arith.addf %14, %15 : vector<64x128xf32>
    %cst_11 = arith.constant 0.000000e+00 : f32
    %17 = vector.broadcast %cst_11 : f32 to vector<64x128xf32>
    %18 = arith.maximumf %16, %17 : vector<64x128xf32>
    %19 = vector.broadcast %6 : vector<64x1xf32> to vector<64x128xf32>
    %20 = arith.mulf %18, %19 : vector<64x128xf32>
    %cst_12 = arith.constant dense<0.000000e+00> : vector<128xf32>
    %21 = vector.multi_reduction <add>, %20, %cst_12 [0] : vector<64x128xf32> to vector<128xf32>
    %22 = vector.shape_cast %21 : vector<128xf32> to vector<1x128xf32>
    %23 = vector.broadcast %7 : vector<1x1xf32> to vector<1x128xf32>
    %24 = arith.addf %22, %23 : vector<1x128xf32>
    %c0_13 = arith.constant 0 : index
    %c0_14 = arith.constant 0 : index
    %25 = vector.load %arg4[%c0_13, %c0_14] : memref<1x128xf32, #tpu.memory_space<vmem>>, vector<1x128xf32>
    tpu.vector_store %arg4[%c0_13, %c0_14], %24 {strides = array<i32>} : memref<1x128xf32, #tpu.memory_space<vmem>>, vector<1x128xf32>,
    return
  }
  func.func @transform_0(%arg0: i32) -> (i32, i32) {
    %c0_i32 = arith.constant 0 : i32
    %c0_i32_0 = arith.constant 0 : i32
    return %arg0, %c0_i32 : i32, i32
  }
  func.func @transform_1(%arg0: i32) -> (i32, i32) {
    %c0_i32 = arith.constant 0 : i32
    %c0_i32_0 = arith.constant 0 : i32
    %c0_i32_1 = arith.constant 0 : i32
    return %c0_i32, %c0_i32_0 : i32, i32
  }
  func.func @transform_2(%arg0: i32) -> (i32, i32) {
    %c0_i32 = arith.constant 0 : i32
    %c0_i32_0 = arith.constant 0 : i32
    %c0_i32_1 = arith.constant 0 : i32
    return %c0_i32, %c0_i32_0 : i32, i32
  }
  func.func @transform_3(%arg0: i32) -> (i32, i32) {
    %c0_i32 = arith.constant 0 : i32
    %c0_i32_0 = arith.constant 0 : i32
    return %c0_i32, %arg0 : i32, i32
  }
}

</mosaic_0001>

<bundles_post_ra>
// kernel: _pallas_forward.1
= control target key start
LH: loop header
LB: loop body
LE: loop exit
PB: predicated region body
PF: predicated region fallthrough
CT: control target
= control target key end

     0   :  { %vm94_vm0 = vcmask 64512   ;;  %v480_v3 = vmov 0   ;;  %vm240_vm1 = vcmask 261120   ;;  %v481_v40 = vmov 1   ;;  %s632_s0 = inlined_call_operand.vmem [shape: f32[128,8], index: 0, kind: input, shape index: {}]   ;;  %s633_s1 = inlined_call_operand.vmem [shape: bf16[96,128], index: 1, kind: input, shape index: {}]   ;;  %s634_s2 = inlined_call_operand.vmem [shape: f32[64,128], index: 2, kind: input, shape index: {}]   ;;  %s635_s3 = inlined_call_operand.vmem [shape: f32[1,128], index: 3, kind: output, shape index: {}]  }
   0x1   :  { %v29_v0 = vld [vmem:[%s632_s0 + $0x70] sm:$0xff]  ;;  %v30_v1 = vld [vmem:[%s632_s0 + $0x78] sm:$0xff]  ;;  %v27_v2 = vld [vmem:[%s632_s0 + $0x60] sm:$0xff]  ;;  %462 = vset.pattern.permute.xlu0 %v480_v3  ;;  %463 = vset.pattern.permute.xlu1 %v480_v3  ;;  %v482_v41 = vmov 2   ;;  %v483_v46 = vmov 3  }
   0x2   :  { %v38_v4 = vpack.c.bf16 %v30_v1, %v29_v0  ;;  %v28_v5 = vld [vmem:[%s632_s0 + $0x68] sm:$0xff]  ;;  %v25_v8 = vld [vmem:[%s632_s0 + $0x50] sm:$0xff]  ;;  %v26_v9 = vld [vmem:[%s632_s0 + $0x58] sm:$0xff] }
   0x3   :  { %v37_v6 = vpack.c.bf16 %v28_v5, %v27_v2  ;;  %v474_v10 = vld [vmem:[%s633_s1] sm:$0xff]   ;;  %v531_v11 = vld [vmem:[%s634_s2 + $0x10] sm:$0xff]  ;;  %v536_v12 = vld [vmem:[%s634_s2 + $0x18] sm:$0xff]  ;;  %v36_v16 = vpack.c.bf16 %v26_v9, %v25_v8 }
   0x4   :  { %450 = vmatprep.subr.msk.bf16.mxu0 %vm94_vm0, %v38_v4  ;;  %v123_v7 = vsel %vm94_vm0, %v38_v4, 0  ;;  %434 = vmatprep.mubr.msk.bf16.mxu0 %vm94_vm0, %v474_v10  ;;  %v51_v14 = vld [vmem:[%s634_s2] sm:$0xff]  ;;  %v52_v15 = vld [vmem:[%s634_s2 + $0x8] sm:$0xff]  ;;  %v21_v21 = vld [vmem:[%s632_s0 + $0x30] sm:$0xff] }
   0x5   :  { %419 = vmatpush3.bf16.xpose.msra.mxu0 %v123_v7  ;;  %v120_v13 = vsel %vm94_vm0, %v37_v6, 0  ;;  %76 = vperm.xlu0 %462, %v531_v11   ;;  %v23_v17 = vld [vmem:[%s632_s0 + $0x40] sm:$0xff]  ;;  %v24_v18 = vld [vmem:[%s632_s0 + $0x48] sm:$0xff]  ;;  %v117_v19 = vsel %vm94_vm0, %v36_v16, 0  ;;  %v22_v22 = vld [vmem:[%s632_s0 + $0x38] sm:$0xff] }
   0x6   :  { %451 = vmatprep.subr.msk.bf16.mxu0 %vm94_vm0, %v37_v6  ;;  %66 = vperm.xlu1 %463, %v51_v14   ;;  %v35_v20 = vpack.c.bf16 %v24_v18, %v23_v17  ;;  %v34_v24 = vpack.c.bf16 %v22_v22, %v21_v21  ;;  %v19_v25 = vld [vmem:[%s632_s0 + $0x20] sm:$0xff]  ;;  %v20_v26 = vld [vmem:[%s632_s0 + $0x28] sm:$0xff]  ;;  %v17_v29 = vld [vmem:[%s632_s0 + $0x10] sm:$0xff] }
   0x7   :  { %v33_v28 = vpack.c.bf16 %v20_v26, %v19_v25  ;;  %v18_v30 = vld [vmem:[%s632_s0 + $0x18] sm:$0xff]  ;;  %v15_v33 = vld [vmem:[%s632_s0] sm:$0xff]  ;;  %v16_v34 = vld [vmem:[%s632_s0 + $0x8] sm:$0xff] }
   0x8   :  { %v114_v23 = vsel %vm94_vm0, %v35_v20, 0  ;;  %v111_v27 = vsel %vm94_vm0, %v34_v24, 0  ;;  %v32_v32 = vpack.c.bf16 %v18_v30, %v17_v29  ;;  %v31_v36 = vpack.c.bf16 %v16_v34, %v15_v33  ;;  %v475_v38 = vld [vmem:[%s633_s1 + $0x8] sm:$0xff]   ;;  %v476_v39 = vld [vmem:[%s633_s1 + $0x10] sm:$0xff]   ;;  %v59_v43 = vld [vmem:[%s634_s2 + $0x20] sm:$0xff] }
   0x9   :  { %81 = vperm.xlu0 %462, %v536_v12   ;;  %v108_v31 = vsel %vm94_vm0, %v33_v28, 0  ;;  %442 = vmatprep.mubr.msk.bf16.mxu1 %vm240_vm1, %v476_v39  ;;  %v60_v42 = vld [vmem:[%s634_s2 + $0x28] sm:$0xff]  ;;  %v61_v44 = vld [vmem:[%s634_s2 + $0x30] sm:$0xff]  ;;  %v63_v45 = vld [vmem:[%s634_s2] sm:$0x1] }
   0xa   :  { %71 = vperm.xlu1 %463, %v52_v15   ;;  %v105_v35 = vsel %vm94_vm0, %v32_v32, 0  ;;  %v102_v37 = vsel %vm94_vm0, %v31_v36, 0  ;;  %v62_v47 = vld [vmem:[%s634_s2 + $0x38] sm:$0xff]  ;;  %v478_v3 = vld [vmem:[%s633_s1 + $0x20] sm:$0xff]   ;;  %v479_v4 = vld [vmem:[%s633_s1 + $0x28] sm:$0xff]  }
   0xb   :  { %v477_v2 = vld [vmem:[%s633_s1 + $0x18] sm:$0xff]  }
   0xd   :  { %421 = vmatpush3.bf16.xpose.msra.mxu0 %v120_v13  ;;  %466 = vset.pattern.permute.xlu0 %v482_v41 }
   0xe   :  { %452 = vmatprep.subr.msk.bf16.mxu0 %vm94_vm0, %v36_v16  ;;  %464 = vset.pattern.permute.xlu1 %v481_v40 }
   0xf   :  { %187 = vperm.xlu1 %464, %v52_v15   ;;  %331 = vperm.xlu0 %466, %v52_v15  }
  0x13   :  { %192 = vperm.xlu1 %464, %v531_v11   ;;  %467 = vset.pattern.permute.xlu0 %v481_v40 }
  0x14   :  { %182 = vperm.xlu0 %467, %v51_v14  }
  0x15   :  { %423 = vmatpush3.bf16.xpose.msra.mxu0 %v117_v19 }
  0x16   :  { %453 = vmatprep.subr.msk.bf16.mxu0 %vm94_vm0, %v35_v20 }
  0x17   :  { %465 = vset.pattern.permute.xlu1 %v482_v41 }
  0x18   :  { %327 = vperm.xlu1 %465, %v51_v14   ;;  %197 = vperm.xlu0 %467, %v536_v12  }
  0x1c   :  { %468 = vset.pattern.permute.xlu1 %v481_v40  ;;  %207 = vperm.xlu0 %467, %v60_v42  }
  0x1d   :  { %425 = vmatpush3.bf16.xpose.msra.mxu0 %v114_v23  ;;  %202 = vperm.xlu1 %468, %v59_v43  }
  0x1e   :  { %454 = vmatprep.subr.msk.bf16.mxu0 %vm94_vm0, %v34_v24 }
  0x20   :  { %471 = vset.pattern.permute.xlu0 %v482_v41 }
  0x21   :  { %469 = vset.pattern.permute.xlu1 %v482_v41  ;;  %343 = vperm.xlu0 %471, %v59_v43  }
  0x22   :  { %335 = vperm.xlu1 %469, %v531_v11  }
  0x25   :  { %427 = vmatpush3.bf16.xpose.msra.mxu0 %v111_v27  ;;  %351 = vperm.xlu0 %471, %v61_v44  }
  0x26   :  { %455 = vmatprep.subr.msk.bf16.mxu0 %vm94_vm0, %v33_v28  ;;  %339 = vperm.xlu1 %469, %v536_v12  }
  0x29   :  { %473 = vset.pattern.permute.xlu0 %v483_v46 }
  0x2a   :  { %470 = vset.pattern.permute.xlu1 %v481_v40  ;;  %381 = vperm.xlu0 %473, %v63_v45  }
  0x2b   :  { %212 = vperm.xlu1 %470, %v61_v44  }
  0x2d   :  { %429 = vmatpush3.bf16.xpose.msra.mxu0 %v108_v31 }
  0x2e   :  { %456 = vmatprep.subr.msk.bf16.mxu0 %vm94_vm0, %v32_v32 }
  0x2f   :  { %217 = vperm.xlu1 %470, %v62_v47  }
  0x33   :  { %472 = vset.pattern.permute.xlu1 %v482_v41 }
  0x34   :  { %347 = vperm.xlu1 %472, %v60_v42  }
  0x35   :  { %431 = vmatpush3.bf16.xpose.msra.mxu0 %v105_v35 }
  0x36   :  { %457 = vmatprep.subr.msk.bf16.mxu0 %vm94_vm0, %v31_v36 }
  0x38   :  { %355 = vperm.xlu1 %472, %v62_v47  }
  0x3d   :  { %433 = vmatpush3.bf16.xpose.msra.mxu0 %v102_v37 }
  0x44   :  { %435 = vmatmul.mubr.msk.bf16.vlgmr.msra.gmra.mxu0 %vm94_vm0, %v475_v38 }
  0x80   :  { %v77_v48 = vpop.permute.xlu0 %76 }
  0x81   :  { %v67_v49 = vpop.permute.xlu1 %66 }
  0x84   :  { %v82_v53 = vpop.permute.xlu0 %81 }
  0x85   :  { %v72_v57 = vpop.permute.xlu1 %71 }
  0x8a   :  { %v188_v5 = vpop.permute.xlu1 %187  ;;  %v332_v9 = vpop.permute.xlu0 %331 }
  0x8e   :  { %v193_v6 = vpop.permute.xlu1 %192 }
  0x8f   :  { %v183_v11 = vpop.permute.xlu0 %182 }
  0x93   :  { %v328_v7 = vpop.permute.xlu1 %327  ;;  %v198_v13 = vpop.permute.xlu0 %197 }
  0x97   :  { %v208_v20 = vpop.permute.xlu0 %207 }
  0x98   :  { %v203_v8 = vpop.permute.xlu1 %202 }
  0x9c   :  { %v344_v34 = vpop.permute.xlu0 %343 }
  0x9d   :  { %v336_v10 = vpop.permute.xlu1 %335 }
  0xa1   :  { %v340_v12 = vpop.permute.xlu1 %339 }
  0xa6   :  { %v213_v16 = vpop.permute.xlu1 %212 }
  0xaa   :  { %v218_v25 = vpop.permute.xlu1 %217 }
  0xaf   :  { %v348_v40 = vpop.permute.xlu1 %347 }
 0x104   :  { %v436_v50 = vpop.f32.mrf.mxu0 }
 0x105   :  { %v168_v52 = vadd.f32 %v436_v50, %v77_v48  ;;  %v352_v50 = vpop.permute.xlu0 %351 }
 0x106   :  { %v159_v51 = vpop.f32.mrf.mxu0 }
 0x107   :  { %v160_v55 = vadd.f32 %v159_v51, %v67_v49  ;;  %v176_v59 = vmax.f32 %v168_v52, 0.0 }
 0x108   :  { %v437_v54 = vpop.f32.mrf.mxu0 }
 0x109   :  { %v171_v56 = vadd.f32 %v437_v54, %v82_v53  ;;  %v174_v62 = vmax.f32 %v160_v55, 0.0  ;;  %v356_v54 = vpop.permute.xlu1 %355 }
 0x10a   :  { %v162_v58 = vpop.f32.mrf.mxu0 }
 0x10b   :  { %v177_v60 = vmax.f32 %v171_v56, 0.0  ;;  %v163_v61 = vadd.f32 %v162_v58, %v72_v57 }
 0x10d   :  { %v175_v63 = vmax.f32 %v163_v61, 0.0  ;;  %v179_v0 = vpack.c.bf16 %v177_v60, %v176_v59 }
 0x10f   :  { %v178_v1 = vpack.c.bf16 %v175_v63, %v174_v62  ;;  %438 = vmatprep.subr.bf16.mxu1 %v179_v0 }
 0x110   :  { %439 = vmatpush3.bf16.msra.mxu1 %v179_v0 }
 0x111   :  { %440 = vmatprep.subr.bf16.mxu1 %v178_v1 }
 0x114   :  { %441 = vmatpush3.bf16.msra.mxu1 %v178_v1  ;;  %v382_v1 = vpop.permute.xlu0 %381 }
 0x117   :  { %443 = vmatmul.mubr.msk.bf16.vlgmr.msra.gmra.mxu1 %vm240_vm1, %v477_v2 }
 0x118   :  { %446 = vmatprep.mubr.msk.bf16.mxu1 %vm240_vm1, %v478_v3 }
 0x11f   :  { %447 = vmatmul.mubr.msk.bf16.gmra.mxu1 %vm240_vm1, %v479_v4 }
 0x1d7   :  { %v444_v14 = vpop.f32.mrf.mxu1 }
 0x1d8   :  { %v296_v19 = vadd.f32 %v444_v14, %v193_v6 }
 0x1d9   :  { %v287_v15 = vpop.f32.mrf.mxu1 }
 0x1da   :  { %v288_v17 = vadd.f32 %v287_v15, %v183_v11  ;;  %v320_v27 = vmax.f32 %v296_v19, 0.0 }
 0x1db   :  { %v445_v18 = vpop.f32.mrf.mxu1 }
 0x1dc   :  { %v318_v22 = vmax.f32 %v288_v17, 0.0  ;;  %v299_v23 = vadd.f32 %v445_v18, %v198_v13  ;;  %v360_v36 = vmul.f32 %v336_v10, %v320_v27 }
 0x1dd   :  { %v290_v21 = vpop.f32.mrf.mxu1 }
 0x1de   :  { %v291_v24 = vadd.f32 %v290_v21, %v188_v5  ;;  %v358_v30 = vmul.f32 %v328_v7, %v318_v22  ;;  %v321_v31 = vmax.f32 %v299_v23, 0.0 }
 0x1df   :  { %v448_v26 = vpop.f32.mrf.mxu1 }
 0x1e0   :  { %v319_v28 = vmax.f32 %v291_v24, 0.0  ;;  %v312_v38 = vadd.f32 %v448_v26, %v213_v16  ;;  %v361_v42 = vmul.f32 %v340_v12, %v321_v31 }
 0x1e1   :  { %v303_v29 = vpop.f32.mrf.mxu1 }
 0x1e2   :  { %v359_v32 = vmul.f32 %v332_v9, %v319_v28  ;;  %v304_v33 = vadd.f32 %v303_v29, %v203_v8  ;;  %v324_v46 = vmax.f32 %v312_v38, 0.0 }
 0x1e3   :  { %v449_v35 = vpop.f32.mrf.mxu1 }
 0x1e4   :  { %v366_v37 = vadd.f32 %v359_v32, %v358_v30  ;;  %v322_v39 = vmax.f32 %v304_v33, 0.0  ;;  %v315_v44 = vadd.f32 %v449_v35, %v218_v25  ;;  %v364_v55 = vmul.f32 %v352_v50, %v324_v46 }
 0x1e5   :  { %v306_v41 = vpop.f32.mrf.mxu1 }
 0x1e6   :  { %v367_v43 = vadd.f32 %v366_v37, %v360_v36  ;;  %v307_v45 = vadd.f32 %v306_v41, %v208_v20  ;;  %v362_v47 = vmul.f32 %v344_v34, %v322_v39  ;;  %v325_v52 = vmax.f32 %v315_v44, 0.0 }
 0x1e8   :  { %v368_v48 = vadd.f32 %v367_v43, %v361_v42  ;;  %v323_v49 = vmax.f32 %v307_v45, 0.0  ;;  %v365_v57 = vmul.f32 %v356_v54, %v325_v52 }
 0x1ea   :  { %v369_v51 = vadd.f32 %v368_v48, %v362_v47  ;;  %v363_v53 = vmul.f32 %v348_v40, %v323_v49 }
 0x1ec   :  { %v370_v56 = vadd.f32 %v369_v51, %v363_v53 }
 0x1ee   :  { %v371_v58 = vadd.f32 %v370_v56, %v364_v55 }
 0x1f0   :  { %v372_v59 = vadd.f32 %v371_v58, %v365_v57 }
 0x1f2   :  { %v373_v60 = vrot.slane %v372_v59, 4 }
 0x1f4   :  { %v374_v61 = vadd.f32 %v373_v60, %v372_v59 }
 0x1f6   :  { %v375_v62 = vrot.slane %v374_v61, 2 }
 0x1f8   :  { %v376_v63 = vadd.f32 %v375_v62, %v374_v61 }
 0x1fa   :  { %v377_v0 = vrot.slane %v376_v63, 1 }
 0x1fc   :  { %v378_v2 = vadd.f32 %v377_v0, %v376_v63 }
 0x1fe   :  { %v384_v3 = vadd.f32 %v382_v1, %v378_v2 }
 0x200   :  { %385 = vst [vmem:[%s635_s3] sm:$0x1] %v384_v3 }

</bundles_post_ra>
